<compile_context>
chip_gen: v7x
topology: tpu7x:2x2x1
jax: 0.10.0
libtpu: 0.0.40
codegen_flags: <defaults>
</compile_context>

<pallas_src>
import functools

import jax
import jax.numpy as jnp
from jax.experimental import pallas as pl
from jax.experimental.pallas import tpu as pltpu

IN_FEATURES = 5
OUT_FEATURES = 10

_SUBLANE = 8
_LANE = 128


def _round_up(v, m):
    return ((v + m - 1) // m) * m


def _linear_kernel(xt_ref, w_ref, b_ref, o_ref, *, n_k):
    """o[out, b] = sum_k w[out, k] * x^T[k, b] + bias[out]   (i.e. y^T).

    xt_ref: (K, TB)        activations, batch on the lane axis
    w_ref : (OUT_pad, K)   nn.Linear weight, OUT padded to a sublane multiple
    b_ref : (OUT_pad, 1)   bias column
    o_ref : (OUT_pad, TB)  lane-dense output tile (y^T)
    """
    # Fused bias add: accumulator starts at the broadcast bias (hoisted once).
    acc = jnp.broadcast_to(b_ref[...], o_ref.shape).astype(jnp.float32)
    xt = xt_ref[...].astype(jnp.float32)
    w = w_ref[...].astype(jnp.float32)
    # K is tiny (5): static-unrolled outer-product adds on the VPU.
    #   (OUT_pad, 1) column of W  *  (1, TB) sublane-broadcast row of x^T
    for k in range(n_k):
        acc = acc + w[:, k:k + 1] * xt[k:k + 1, :]
    if acc.dtype == o_ref.dtype:
        o_ref[...] = acc
    else:
        o_ref[...] = acc.astype(o_ref.dtype)


def prepare_linear_params(weight, bias):
    """One-time (param-init) layout work: pad OUT up to a sublane multiple.

    weight: (OUT, IN)   bias: (OUT,)
    Returns (w_p, b_p, out_features) with w_p: (OUT_pad, IN), b_p: (OUT_pad, 1).
    """
    out_f, k = weight.shape
    out_pad = _round_up(out_f, _SUBLANE)           # 10 -> 16
    w_p = jnp.pad(weight, ((0, out_pad - out_f), (0, 0)))
    b_p = jnp.pad(bias.reshape(out_f, 1), ((0, out_pad - out_f), (0, 0)))
    return w_p, b_p, out_f


def linear_forward(x, w_p, b_p, out_features, *, tb_max=8192):
    """Equivalent of torch.nn.Linear: y = x @ weight.T + bias.

    x: (B, IN)   w_p: (OUT_pad, IN)   b_p: (OUT_pad, 1)   ->   (B, OUT)
    """
    B, K = x.shape
    out_pad = w_p.shape[0]
    assert w_p.shape[1] == K

    # ---- batch tiling: lane-axis tile, balanced steps, minimal padding ----
    num_steps = max(1, -(-B // tb_max))
    if num_steps > 1 and num_steps % 2 == 1:
        num_steps += 1                      # even step count -> both v7x TCs busy
    tb = max(_LANE, _round_up(-(-B // num_steps), _LANE))
    b_pad = num_steps * tb

    # Batch onto the lane axis; single fused transpose+pad pass (x is only
    # K=5 columns wide, so this is tiny next to the saved output traffic).
    x_t = jnp.pad(x.T, ((0, 0), (0, b_pad - B)))

    kernel = functools.partial(_linear_kernel, n_k=K)

    itemsize = jnp.dtype(x.dtype).itemsize
    cost = pl.CostEstimate(
        flops=2 * B * K * out_features,
        transcendentals=0,
        bytes_accessed=(x_t.size + w_p.size + b_p.size + out_pad * b_pad)
        * itemsize,
    )

    out_t = pl.pallas_call(
        kernel,
        out_shape=jax.ShapeDtypeStruct((out_pad, b_pad), x.dtype),
        grid=(num_steps,),
        in_specs=[
            pl.BlockSpec((K, tb), lambda i: (0, i)),        # x^T batch tile
            pl.BlockSpec((out_pad, K), lambda i: (0, 0)),   # resident weight
            pl.BlockSpec((out_pad, 1), lambda i: (0, 0)),   # resident bias
        ],
        out_specs=pl.BlockSpec((out_pad, tb), lambda i: (0, i)),
        compiler_params=pltpu.CompilerParams(
            dimension_semantics=("parallel",)),
        cost_estimate=cost,
    )(x_t, w_p, b_p)

    # (OUT_pad, B_pad) -> (B, OUT): tiny slice+transpose over 16 sublanes,
    # ~8x less HBM traffic than slicing a 128-lane-padded row-major output.
    return out_t[:out_features, :B].T


if __name__ == "__main__":
    key = jax.random.PRNGKey(0)
    k_x, k_w, k_b = jax.random.split(key, 3)

    batch = 8
    # Deterministic params mimicking nn.Linear's uniform(-1/sqrt(in), 1/sqrt(in))
    bound = 1.0 / (IN_FEATURES ** 0.5)
    weight = jax.random.uniform(
        k_w, (OUT_FEATURES, IN_FEATURES), jnp.float32, minval=-bound, maxval=bound
    )
    bias = jax.random.uniform(
        k_b, (OUT_FEATURES,), jnp.float32, minval=-bound, maxval=bound
    )
    x = jax.random.normal(k_x, (batch, IN_FEATURES), jnp.float32)

    # One-time parameter layout prep (hoisted out of the forward pass).
    w_p, b_p, out_features = prepare_linear_params(weight, bias)

    fwd = jax.jit(functools.partial(
        linear_forward, w_p=w_p, b_p=b_p, out_features=out_features))
    out = jax.block_until_ready(fwd(x))

    # Sanity check against plain-JAX reference (same semantics as nn.Linear).
    ref = x @ weight.T + bias
    assert out.shape == (batch, OUT_FEATURES)
    assert jnp.allclose(out, ref, atol=1e-5, rtol=1e-5)

    print("KERNEL_OK")
</pallas_src>

<mosaic_0001>
module attributes {stable_mosaic.version = 11 : i64} {
  func.func @_linear_kernel(%arg0: i32, %arg1: memref<5x128xf32, #tpu.memory_space<vmem>>, %arg2: memref<16x5xf32, #tpu.memory_space<vmem>>, %arg3: memref<16x1xf32, #tpu.memory_space<vmem>>, %arg4: memref<16x128xf32, #tpu.memory_space<vmem>>) attributes {dimension_semantics = [#tpu.dimension_semantics<parallel>], iteration_bounds = array<i64: 1>, scalar_prefetch = 0 : i64, scratch_operands = 0 : i64, tpu.core_type = #tpu.core_type<tc>, window_params = [{transform_indices = @transform_0, window_bounds = array<i64: 5, 128>}, {pipeline_mode = #tpu.pipeline_mode<synchronous>, transform_indices = @transform_1, window_bounds = array<i64: 16, 5>}, {pipeline_mode = #tpu.pipeline_mode<synchronous>, transform_indices = @transform_2, window_bounds = array<i64: 16, 1>}, {transform_indices = @transform_3, window_bounds = array<i64: 16, 128>}]} {
    %c0 = arith.constant 0 : index
    %c0_0 = arith.constant 0 : index
    %0 = vector.load %arg3[%c0, %c0_0] : memref<16x1xf32, #tpu.memory_space<vmem>>, vector<16x1xf32>
    %1 = vector.shape_cast %0 : vector<16x1xf32> to vector<16x1xf32>
    %2 = vector.broadcast %1 : vector<16x1xf32> to vector<16x128xf32>
    %c0_1 = arith.constant 0 : index
    %c0_2 = arith.constant 0 : index
    %3 = vector.load %arg1[%c0_1, %c0_2] : memref<5x128xf32, #tpu.memory_space<vmem>>, vector<5x128xf32>
    %c0_3 = arith.constant 0 : index
    %c0_4 = arith.constant 0 : index
    %4 = vector.load %arg2[%c0_3, %c0_4] : memref<16x5xf32, #tpu.memory_space<vmem>>, vector<16x5xf32>
    %5 = vector.extract_strided_slice %4 {offsets = [0, 0], sizes = [16, 1], strides = [1, 1]} : vector<16x5xf32> to vector<16x1xf32>
    %6 = vector.extract_strided_slice %3 {offsets = [0, 0], sizes = [1, 128], strides = [1, 1]} : vector<5x128xf32> to vector<1x128xf32>
    %7 = vector.broadcast %5 : vector<16x1xf32> to vector<16x128xf32>
    %8 = vector.broadcast %6 : vector<1x128xf32> to vector<16x128xf32>
    %9 = arith.mulf %7, %8 : vector<16x128xf32>
    %10 = arith.addf %2, %9 : vector<16x128xf32>
    %11 = vector.extract_strided_slice %4 {offsets = [0, 1], sizes = [16, 1], strides = [1, 1]} : vector<16x5xf32> to vector<16x1xf32>
    %12 = vector.extract_strided_slice %3 {offsets = [1, 0], sizes = [1, 128], strides = [1, 1]} : vector<5x128xf32> to vector<1x128xf32>
    %13 = vector.broadcast %11 : vector<16x1xf32> to vector<16x128xf32>
    %14 = vector.broadcast %12 : vector<1x128xf32> to vector<16x128xf32>
    %15 = arith.mulf %13, %14 : vector<16x128xf32>
    %16 = arith.addf %10, %15 : vector<16x128xf32>
    %17 = vector.extract_strided_slice %4 {offsets = [0, 2], sizes = [16, 1], strides = [1, 1]} : vector<16x5xf32> to vector<16x1xf32>
    %18 = vector.extract_strided_slice %3 {offsets = [2, 0], sizes = [1, 128], strides = [1, 1]} : vector<5x128xf32> to vector<1x128xf32>
    %19 = vector.broadcast %17 : vector<16x1xf32> to vector<16x128xf32>
    %20 = vector.broadcast %18 : vector<1x128xf32> to vector<16x128xf32>
    %21 = arith.mulf %19, %20 : vector<16x128xf32>
    %22 = arith.addf %16, %21 : vector<16x128xf32>
    %23 = vector.extract_strided_slice %4 {offsets = [0, 3], sizes = [16, 1], strides = [1, 1]} : vector<16x5xf32> to vector<16x1xf32>
    %24 = vector.extract_strided_slice %3 {offsets = [3, 0], sizes = [1, 128], strides = [1, 1]} : vector<5x128xf32> to vector<1x128xf32>
    %25 = vector.broadcast %23 : vector<16x1xf32> to vector<16x128xf32>
    %26 = vector.broadcast %24 : vector<1x128xf32> to vector<16x128xf32>
    %27 = arith.mulf %25, %26 : vector<16x128xf32>
    %28 = arith.addf %22, %27 : vector<16x128xf32>
    %29 = vector.extract_strided_slice %4 {offsets = [0, 4], sizes = [16, 1], strides = [1, 1]} : vector<16x5xf32> to vector<16x1xf32>
    %30 = vector.extract_strided_slice %3 {offsets = [4, 0], sizes = [1, 128], strides = [1, 1]} : vector<5x128xf32> to vector<1x128xf32>
    %31 = vector.broadcast %29 : vector<16x1xf32> to vector<16x128xf32>
    %32 = vector.broadcast %30 : vector<1x128xf32> to vector<16x128xf32>
    %33 = arith.mulf %31, %32 : vector<16x128xf32>
    %34 = arith.addf %28, %33 : vector<16x128xf32>
    %c0_5 = arith.constant 0 : index
    %c0_6 = arith.constant 0 : index
    %35 = vector.load %arg4[%c0_5, %c0_6] : memref<16x128xf32, #tpu.memory_space<vmem>>, vector<16x128xf32>
    tpu.vector_store %arg4[%c0_5, %c0_6], %34 {strides = array<i32>} : memref<16x128xf32, #tpu.memory_space<vmem>>, vector<16x128xf32>,
    return
  }
  func.func @transform_0(%arg0: i32) -> (i32, i32) {
    %c0_i32 = arith.constant 0 : i32
    %c0_i32_0 = arith.constant 0 : i32
    return %c0_i32, %arg0 : i32, i32
  }
  func.func @transform_1(%arg0: i32) -> (i32, i32) {
    %c0_i32 = arith.constant 0 : i32
    %c0_i32_0 = arith.constant 0 : i32
    %c0_i32_1 = arith.constant 0 : i32
    return %c0_i32, %c0_i32_0 : i32, i32
  }
  func.func @transform_2(%arg0: i32) -> (i32, i32) {
    %c0_i32 = arith.constant 0 : i32
    %c0_i32_0 = arith.constant 0 : i32
    %c0_i32_1 = arith.constant 0 : i32
    return %c0_i32, %c0_i32_0 : i32, i32
  }
  func.func @transform_3(%arg0: i32) -> (i32, i32) {
    %c0_i32 = arith.constant 0 : i32
    %c0_i32_0 = arith.constant 0 : i32
    return %c0_i32, %arg0 : i32, i32
  }
}

</mosaic_0001>

<bundles_post_ra>
// kernel: linear_forward.1
= control target key start
LH: loop header
LB: loop body
LE: loop exit
PB: predicated region body
PF: predicated region fallthrough
CT: control target
= control target key end

     0   :  { %v131_v0 = vmov 0   ;;  %v132_v5 = vmov 1   ;;  %v133_v6 = vmov 2   ;;  %v134_v7 = vmov 3   ;;  %s177_s2 = inlined_call_operand.vmem [shape: f32[16,1], index: 2, kind: input, shape index: {}]   ;;  %s178_s1 = inlined_call_operand.vmem [shape: f32[16,5], index: 1, kind: input, shape index: {}]   ;;  %s179_s0 = inlined_call_operand.vmem [shape: f32[5,128], index: 0, kind: input, shape index: {}]   ;;  %s180_s3 = inlined_call_operand.vmem [shape: f32[16,128], index: 3, kind: output, shape index: {}]  }
   0x1   :  { %123 = vset.pattern.permute.xlu1 %v131_v0  ;;  %122 = vset.pattern.permute.xlu0 %v131_v0  ;;  %v14_v1 = vld [vmem:[%s177_s2] sm:$0xff]  ;;  %v15_v3 = vld [vmem:[%s177_s2 + $0x8] sm:$0xff]  ;;  %v135_v8 = vmov 4   ;;  %v39_v9 = vlaneseq }
   0x2   :  { %v27_v2 = vld [vmem:[%s178_s1] sm:$0xff]  ;;  %18 = vperm.xlu1 %123, %v14_v1   ;;  %v28_v4 = vld [vmem:[%s178_s1 + $0x8] sm:$0xff] }
   0x3   :  { %31 = vperm.xlu0 %122, %v27_v2   ;;  %v40_v11 = vshrl.u32 %v39_v9, 7  ;;  %v26_v16 = vld [vmem:[%s179_s0] sm:$0x1f] }
   0x5   :  { %v41_v13 = vsub.s32 0, %v40_v11  ;;  %v57_v17 = vsub.s32 1, %v40_v11  ;;  %v73_v19 = vsub.s32 2, %v40_v11  ;;  %v89_v25 = vsub.s32 3, %v40_v11 }
   0x6   :  { %23 = vperm.xlu1 %123, %v15_v3   ;;  %v105_v26 = vsub.s32 4, %v40_v11 }
   0x7   :  { %36 = vperm.xlu0 %122, %v28_v4   ;;  %v42_v18 = vrot.slane %v26_v16, %v41_v13  ;;  %v58_v22 = vrot.slane %v26_v16, %v57_v17  ;;  %v74_v24 = vrot.slane %v26_v16, %v73_v19  ;;  %v90_v32 = vrot.slane %v26_v16, %v89_v25 }
   0x8   :  { %v106_v33 = vrot.slane %v26_v16, %v105_v26 }
   0xa   :  { %125 = vset.pattern.permute.xlu1 %v132_v5 }
   0xb   :  { %124 = vset.pattern.permute.xlu0 %v132_v5  ;;  %52 = vperm.xlu1 %125, %v28_v4  }
   0xc   :  { %48 = vperm.xlu0 %124, %v27_v2  }
   0xf   :  { %126 = vset.pattern.permute.xlu1 %v133_v6 }
  0x10   :  { %127 = vset.pattern.permute.xlu0 %v133_v6  ;;  %64 = vperm.xlu1 %126, %v27_v2  }
  0x11   :  { %68 = vperm.xlu0 %127, %v28_v4  }
  0x14   :  { %128 = vset.pattern.permute.xlu1 %v134_v7 }
  0x15   :  { %129 = vset.pattern.permute.xlu0 %v135_v8  ;;  %80 = vperm.xlu1 %128, %v27_v2  }
  0x16   :  { %96 = vperm.xlu0 %129, %v27_v2  }
  0x19   :  { %84 = vperm.xlu1 %128, %v28_v4  }
  0x1d   :  { %130 = vset.pattern.permute.xlu1 %v135_v8 }
  0x1e   :  { %100 = vperm.xlu1 %130, %v28_v4  }
  0x81   :  { %v19_v10 = vpop.permute.xlu1 %18 }
  0x82   :  { %v32_v12 = vpop.permute.xlu0 %31 }
  0x83   :  { %v43_v23 = vmul.f32 %v42_v18, %v32_v12 }
  0x85   :  { %v24_v14 = vpop.permute.xlu1 %23  ;;  %v45_v30 = vadd.f32 %v43_v23, %v19_v10 }
  0x86   :  { %v37_v15 = vpop.permute.xlu0 %36 }
  0x87   :  { %v44_v35 = vmul.f32 %v42_v18, %v37_v15 }
  0x89   :  { %v46_v43 = vadd.f32 %v44_v35, %v24_v14 }
  0x8a   :  { %v53_v20 = vpop.permute.xlu1 %52 }
  0x8b   :  { %v49_v21 = vpop.permute.xlu0 %48  ;;  %v60_v41 = vmul.f32 %v58_v22, %v53_v20 }
  0x8c   :  { %v59_v27 = vmul.f32 %v58_v22, %v49_v21 }
  0x8d   :  { %v62_v47 = vadd.f32 %v60_v41, %v46_v43 }
  0x8e   :  { %v61_v34 = vadd.f32 %v59_v27, %v45_v30 }
  0x8f   :  { %v65_v28 = vpop.permute.xlu1 %64 }
  0x90   :  { %v69_v29 = vpop.permute.xlu0 %68  ;;  %v75_v31 = vmul.f32 %v74_v24, %v65_v28 }
  0x91   :  { %v76_v44 = vmul.f32 %v74_v24, %v69_v29 }
  0x92   :  { %v77_v38 = vadd.f32 %v75_v31, %v61_v34 }
  0x93   :  { %v78_v49 = vadd.f32 %v76_v44, %v62_v47 }
  0x94   :  { %v81_v36 = vpop.permute.xlu1 %80 }
  0x95   :  { %v97_v37 = vpop.permute.xlu0 %96  ;;  %v91_v39 = vmul.f32 %v90_v32, %v81_v36 }
  0x96   :  { %v107_v40 = vmul.f32 %v106_v33, %v97_v37 }
  0x97   :  { %v93_v42 = vadd.f32 %v91_v39, %v77_v38 }
  0x98   :  { %v85_v45 = vpop.permute.xlu1 %84 }
  0x99   :  { %v109_v46 = vadd.f32 %v107_v40, %v93_v42  ;;  %v92_v48 = vmul.f32 %v90_v32, %v85_v45 }
  0x9b   :  { %111 = vst [vmem:[%s180_s3] sm:$0xff] %v109_v46  ;;  %v94_v51 = vadd.f32 %v92_v48, %v78_v49 }
  0x9d   :  { %v101_v50 = vpop.permute.xlu1 %100 }
  0x9e   :  { %v108_v52 = vmul.f32 %v106_v33, %v101_v50 }
  0xa0   :  { %v110_v53 = vadd.f32 %v108_v52, %v94_v51 }
  0xa2   :  { %112 = vst [vmem:[%s180_s3 + $0x8] sm:$0xff] %v110_v53 }

</bundles_post_ra>
